<compile_context>
chip_gen: v7x
topology: tpu7x:2x2x1
jax: 0.10.0
libtpu: 0.0.40
codegen_flags: <defaults>
</compile_context>

<pallas_src>
import functools

import numpy as np
import jax
import jax.numpy as jnp
from jax.experimental import pallas as pl
from jax.experimental.pallas import tpu as pltpu

_LANE = 128
_ROW_GRAN = 16                           # fits both f32 (8,128) and bf16 (16,128)
_TARGET_BLOCK_BYTES = 4 * 1024 * 1024    # ~4 MiB/block -> ~8 MiB double-buffered
_P_VMEM_BUDGET = 4 * 1024 * 1024         # max bytes for the resident gather matrix
_VMEM_LIMIT_BYTES = 64 * 1024 * 1024     # safe on v5e/v6e (128 MiB) and v7x (64 MiB)


def _round_up(a, b):
    return ((a + b - 1) // b) * b


def _choose_tile_n(n, row_bytes):
    tile = _TARGET_BLOCK_BYTES // max(row_bytes, 1)
    tile = max(_ROW_GRAN, (tile // _ROW_GRAN) * _ROW_GRAN)
    return min(tile, _round_up(n, _ROW_GRAN))


def _count_tile(g, row_start, n_rows, ragged):
    """Per-column violation counts for one (tile_n, M_pad) row tile."""
    m = g.shape[-1]
    # Direct comparisons (a - b < 0  <=>  a < b): no subtracts, no upcast of
    # the whole tile.  Rolls are XLU work (free slot next to the VPU compares).
    g1 = pltpu.roll(g, shift=m - 1, axis=1)      # g[:, j+1] (wrap cols masked later)
    g2 = pltpu.roll(g, shift=m - 2, axis=1)      # g[:, j+2]
    viol = jnp.logical_and(g1 < g, g2 > g1).astype(jnp.float32)
    if ragged:
        # Only emitted when N % tile_n != 0: mask rows past the real row count
        # (the OOB part of the boundary block holds undefined data).
        row = jax.lax.broadcasted_iota(jnp.int32, (g.shape[0], 1), 0) + row_start
        viol = jnp.where(row < n_rows, viol, 0.0)
    return jnp.sum(viol, axis=0, keepdims=True)  # (1, M_pad) lane-dense


def _fused_kernel(x_ref, p_ref, out_ref, *, n_rows, tile_n, ragged):
    # x_ref : (tile_n, M) raw input rows (no pre-pass over HBM).
    # p_ref : (M, M_pad) 0/1 compaction matrix (kept columns first), resident
    #         in VMEM for the whole grid (constant index_map).
    # out_ref: (1, 1, M_pad) f32 per-column partial counts.
    x = x_ref[...]
    # The matmul is an exact column select: P entries are 0/1 and each output
    # column has exactly one contribution (HIGHEST precision keeps f32 exact).
    prec = jax.lax.Precision.HIGHEST if x.dtype == jnp.float32 else None
    g = jnp.dot(x, p_ref[...], preferred_element_type=jnp.float32, precision=prec)
    partial = _count_tile(g, pl.program_id(0) * tile_n, n_rows, ragged)
    out_ref[...] = partial.reshape(1, 1, partial.shape[-1])


def _plain_kernel(x_ref, out_ref, *, n_rows, tile_n, ragged):
    # Fallback path: x_ref is already compacted + lane padded (tile_n, M_pad).
    partial = _count_tile(x_ref[...], pl.program_id(0) * tile_n, n_rows, ragged)
    out_ref[...] = partial.reshape(1, 1, partial.shape[-1])


def unimodal_loss(distribution, *, block_rows=None):
    """distribution: (N, M) array. Returns the scalar unimodal penalty (f32)."""
    dist = jnp.asarray(distribution)
    if dist.dtype not in (jnp.float32, jnp.bfloat16):
        dist = dist.astype(jnp.float32)
    n, m = dist.shape
    itemsize = dist.dtype.itemsize
    m_pad = _round_up(m, _LANE)

    # ---------------- O(M) glue: column mask + compaction order --------------
    # (one read of (N, M) for the abs-sum; the kernel itself is the second —
    # the algorithm needs the global mask before compaction, so 2 reads total.)
    col_abs = jnp.sum(jnp.abs(dist), axis=0, dtype=jnp.float32)        # (M,)
    mask = col_abs != 0.0
    k = jnp.sum(mask.astype(jnp.int32))                                # kept cols
    pos = jnp.cumsum(mask.astype(jnp.int32)) - 1                       # dest slot
    dest = jnp.where(mask, pos, m_pad)                                 # dropped -> OOB
    col_ids = jnp.arange(m, dtype=jnp.int32)

    fuse_gather = m * m_pad * itemsize <= _P_VMEM_BUDGET

    if block_rows is None:
        in_lane = m if fuse_gather else m_pad
        tile_n = _choose_tile_n(n, in_lane * itemsize)
    else:
        tile_n = _round_up(block_rows, _ROW_GRAN)
    num_tiles = _round_up(n, tile_n) // tile_n
    ragged = (n % tile_n) != 0

    out_shape = jax.ShapeDtypeStruct((num_tiles, 1, m_pad), jnp.float32)
    out_spec = pl.BlockSpec((1, 1, m_pad), lambda i: (i, 0, 0))
    cparams = pltpu.CompilerParams(
        dimension_semantics=("parallel",),          # shards rows across TCs on v7x
        vmem_limit_bytes=_VMEM_LIMIT_BYTES)

    if fuse_gather:
        # 0/1 matrix that puts kept columns first (stable order); the gather
        # runs on the MXU inside the kernel, so no extra HBM pass over (N, M).
        perm = jnp.zeros((m, m_pad), dist.dtype).at[col_ids, dest].set(1, mode="drop")
        kernel = functools.partial(_fused_kernel, n_rows=n, tile_n=tile_n, ragged=ragged)
        partials = pl.pallas_call(
            kernel,
            out_shape=out_shape,
            grid=(num_tiles,),
            in_specs=[pl.BlockSpec((tile_n, m), lambda i: (i, 0)),
                      pl.BlockSpec((m, m_pad), lambda i: (0, 0))],  # VMEM-resident
            out_specs=out_spec,
            compiler_params=cparams,
        )(dist, perm)
    else:
        # Very wide M: permutation matrix would not fit VMEM.  Fall back to a
        # fixed-shape stable XLA gather (OOB indices -> zero fill, no jnp.pad).
        order = jnp.full((m_pad,), m, jnp.int32).at[dest].set(col_ids, mode="drop")
        gathered = jnp.take(dist, order, axis=1, mode="fill", fill_value=0)
        kernel = functools.partial(_plain_kernel, n_rows=n, tile_n=tile_n, ragged=ragged)
        partials = pl.pallas_call(
            kernel,
            out_shape=out_shape,
            grid=(num_tiles,),
            in_specs=[pl.BlockSpec((tile_n, m_pad), lambda i: (i, 0))],
            out_specs=out_spec,
            compiler_params=cparams,
        )(gathered)

    # Column-validity mask applied once on the tiny (M_pad,) partials:
    # only j < K-2 are real (non-wrap, non-padded) kept-column triples.
    col_sums = jnp.sum(partials, axis=(0, 1))                          # (M_pad,)
    lane_ids = jnp.arange(m_pad, dtype=jnp.int32)
    total = jnp.sum(jnp.where(lane_ids < (k - 2), col_sums, 0.0))
    # violation.float().sum(dim=1).mean() == total / N (full, original row count)
    return total / jnp.float32(n)


def _reference_numpy(dist_np):
    # Direct transcription of the PyTorch forward (dynamic shapes OK here).
    dist_np = np.asarray(dist_np).astype(np.float64)
    mask = np.abs(dist_np).sum(axis=0) != 0.0
    sub = dist_np[:, mask]
    diffs = np.diff(sub, axis=1)
    viol = (diffs[:, :-1] < 0) & (diffs[:, 1:] > 0)
    return viol.astype(np.float64).sum(axis=1).mean()


if __name__ == "__main__":
    key = jax.random.PRNGKey(0)
    k1, k2 = jax.random.split(key)

    # Test 1: f32, fused MXU-gather path, single (ragged) row tile.
    N, M = 8, 32
    x = jax.random.normal(k1, (N, M), dtype=jnp.float32)
    keep = jnp.ones((M,), jnp.float32).at[jnp.array([3, 7, 10, 20, 31])].set(0.0)
    x = x * keep[None, :]
    out1 = jax.block_until_ready(unimodal_loss(x))
    ref1 = _reference_numpy(np.asarray(x))
    assert np.isclose(float(out1), float(ref1), rtol=1e-5, atol=1e-5), (
        f"mismatch: kernel={float(out1)} ref={float(ref1)}")

    # Test 2: bf16, multiple row tiles + ragged last tile (resident P reused).
    N2, M2 = 40, 48
    y = jax.random.normal(k2, (N2, M2), dtype=jnp.float32)
    keep2 = jnp.ones((M2,), jnp.float32).at[jnp.array([0, 5, 17, 33, 47])].set(0.0)
    y = (y * keep2[None, :]).astype(jnp.bfloat16)
    out2 = jax.block_until_ready(unimodal_loss(y, block_rows=16))
    ref2 = _reference_numpy(np.asarray(y))
    assert np.isclose(float(out2), float(ref2), rtol=1e-5, atol=1e-5), (
        f"mismatch: kernel={float(out2)} ref={float(ref2)}")

    print("KERNEL_OK")
</pallas_src>

<mosaic_0001>
module attributes {stable_mosaic.version = 11 : i64} {
  func.func @_fused_kernel(%arg0: i32, %arg1: memref<16x32xf32, #tpu.memory_space<vmem>>, %arg2: memref<32x128xf32, #tpu.memory_space<vmem>>, %arg3: memref<1x1x128xf32, #tpu.memory_space<vmem>>) attributes {dimension_semantics = [#tpu.dimension_semantics<parallel>], iteration_bounds = array<i64: 1>, scalar_prefetch = 0 : i64, scratch_operands = 0 : i64, tpu.core_type = #tpu.core_type<tc>, window_params = [{transform_indices = @transform_0, window_bounds = array<i64: 16, 32>}, {pipeline_mode = #tpu.pipeline_mode<synchronous>, transform_indices = @transform_1, window_bounds = array<i64: 32, 128>}, {transform_indices = @transform_2, window_bounds = array<i64: 1, 1, 128>}]} {
    %c0 = arith.constant 0 : index
    %c0_0 = arith.constant 0 : index
    %0 = vector.load %arg1[%c0, %c0_0] : memref<16x32xf32, #tpu.memory_space<vmem>>, vector<16x32xf32>
    %c0_1 = arith.constant 0 : index
    %c0_2 = arith.constant 0 : index
    %1 = vector.load %arg2[%c0_1, %c0_2] : memref<32x128xf32, #tpu.memory_space<vmem>>, vector<32x128xf32>
    %cst = arith.constant dense<0.000000e+00> : vector<16x128xf32>
    %2 = tpu.matmul %0, %1, %cst {dimension_numbers = #tpu.dot_dimension_numbers<[1], [0], [0], [1], [0, 0, 1, 1], [], []>, precision = #tpu.contract_precision<fp32>} : vector<16x32xf32>, vector<32x128xf32>, vector<16x128xf32> -> vector<16x128xf32>
    %c16_i32 = arith.constant 16 : i32
    %3 = arith.muli %arg0, %c16_i32 : i32
    %c127_i32 = arith.constant 127 : i32
    %4 = tpu.dynamic_rotate %2 by %c127_i32 dim 1 : vector<16x128xf32>, i32 -> vector<16x128xf32>
    %c126_i32 = arith.constant 126 : i32
    %5 = tpu.dynamic_rotate %2 by %c126_i32 dim 1 : vector<16x128xf32>, i32 -> vector<16x128xf32>
    %6 = arith.cmpf olt, %4, %2 : vector<16x128xf32>
    %7 = arith.cmpf ogt, %5, %4 : vector<16x128xf32>
    %8 = arith.andi %6, %7 : vector<16x128xi1>
    %9 = arith.extui %8 : vector<16x128xi1> to vector<16x128xi32>
    %10 = arith.sitofp %9 : vector<16x128xi32> to vector<16x128xf32>
    %11 = tpu.iota {dimensions = array<i32: 0>} : vector<16x1xi32>
    %12 = vector.broadcast %3 : i32 to vector<16x1xi32>
    %13 = arith.addi %11, %12 : vector<16x1xi32>
    %c8_i32 = arith.constant 8 : i32
    %14 = vector.broadcast %c8_i32 : i32 to vector<16x1xi32>
    %15 = arith.cmpi slt, %13, %14 : vector<16x1xi32>
    %cst_3 = arith.constant 0.000000e+00 : f32
    %16 = vector.shape_cast %15 : vector<16x1xi1> to vector<16x1xi1>
    %17 = vector.broadcast %16 : vector<16x1xi1> to vector<16x128xi1>
    %18 = vector.broadcast %cst_3 : f32 to vector<16x128xf32>
    %19 = arith.select %17, %10, %18 : vector<16x128xi1>, vector<16x128xf32>
    %cst_4 = arith.constant dense<0.000000e+00> : vector<128xf32>
    %20 = vector.multi_reduction <add>, %19, %cst_4 [0] : vector<16x128xf32> to vector<128xf32>
    %21 = vector.shape_cast %20 : vector<128xf32> to vector<1x128xf32>
    %22 = vector.shape_cast %21 : vector<1x128xf32> to vector<1x1x128xf32>
    %c0_5 = arith.constant 0 : index
    %c0_6 = arith.constant 0 : index
    %c0_7 = arith.constant 0 : index
    %23 = vector.load %arg3[%c0_5, %c0_6, %c0_7] : memref<1x1x128xf32, #tpu.memory_space<vmem>>, vector<1x1x128xf32>
    tpu.vector_store %arg3[%c0_5, %c0_6, %c0_7], %22 {strides = array<i32>} : memref<1x1x128xf32, #tpu.memory_space<vmem>>, vector<1x1x128xf32>,
    return
  }
  func.func @transform_0(%arg0: i32) -> (i32, i32) {
    %c0_i32 = arith.constant 0 : i32
    %c0_i32_0 = arith.constant 0 : i32
    return %arg0, %c0_i32 : i32, i32
  }
  func.func @transform_1(%arg0: i32) -> (i32, i32) {
    %c0_i32 = arith.constant 0 : i32
    %c0_i32_0 = arith.constant 0 : i32
    %c0_i32_1 = arith.constant 0 : i32
    return %c0_i32, %c0_i32_0 : i32, i32
  }
  func.func @transform_2(%arg0: i32) -> (i32, i32, i32) {
    %c0_i32 = arith.constant 0 : i32
    %c0_i32_0 = arith.constant 0 : i32
    %c0_i32_1 = arith.constant 0 : i32
    return %arg0, %c0_i32, %c0_i32_0 : i32, i32, i32
  }
}

</mosaic_0001>

<bundles_post_ra>
// kernel: tpu_custom_call.1
= control target key start
LH: loop header
LB: loop body
LE: loop exit
PB: predicated region body
PF: predicated region fallthrough
CT: control target
= control target key end

     0   :  { %7 = vsyncpa [#allocation3], 0  ;;  %s950_s0 = inlined_call_operand.hbm [shape: f32[8,32], index: 0, kind: input, shape index: {}]   ;;  %s951_s1 = inlined_call_operand.hbm [shape: f32[32,128], index: 1, kind: input, shape index: {}]   ;;  %s952_s2 = inlined_call_operand.hbm [shape: f32[1,1,128], index: 2, kind: output, shape index: {}]  }
   0x1   :  { %8 = vsyncpa [#allocation6], 0 }
   0x2   :  { %9 = vsyncpa [#allocation4], 0 }
   0x3   :  { %14 = vsyncadd [#allocation3], 128  ;;  %s879_s9 = smov [#allocation2]   ;;  %s807_s13 = scalar_lea.hbm %s950_s0, 128 }
   0x4   :  { %s15_s10 = sshll.u32 %s879_s9, 4  ;;  %p808_p0 = scmp.ne.s32.totalorder %s950_s0, %s807_s13  ;;  %s16_s10 = int_to_ptr.vmem [resolvable:$true] %s15_s10 }
   0x5   :  { %p811_p1 = scmp.lt.u32.totalorder %s807_s13, %s950_s0 }
   0x7   :  { %p813_p2 = pnand %p811_p1, %p808_p0 }
   0x9   :  { %816 = shalt.err (!%p813_p2)
}
   0xa   :  { %s817_s18 = scalar_lea.vmem %s16_s10, 128  ;;  %s821_s19 = scalar_lea.vmem %s16_s10, 256 }
   0xb   :  { %p818_p3 = scmp.ne.s32.totalorder %s16_s10, %s817_s18  ;;  %p822_p4 = scmp.lt.s32.totalorder %s16_s10, %s16_s10 }
   0xc   :  { %p823_p5 = scmp.lt.s32.totalorder %s821_s19, %s817_s18 }
   0xe   :  { %p824_p6 = por %p823_p5, %p822_p4 }
  0x10   :  { %p825_p7 = pnand %p824_p6, %p818_p3 }
  0x12   :  { %828 = shalt.err (!%p825_p7)
}
  0x13   :  { %s880_s20 = smov 128   ;;  %s881_s21 = smov 8  }
  0x14   :  { %21 = dma.hbm_to_vmem [thread:$0]  %s950_s0, 128, %s16_s10, [#allocation3], %s880_s20, %s880_s20, %s881_s21  }
  0x15   :  { %s882_s24 = smov [#allocation5]   ;;  %s829_s28 = scalar_lea.hbm %s951_s1, 512 }
  0x16   :  { %s27_s25 = sshll.u32 %s882_s24, 4  ;;  %p830_p8 = scmp.ne.s32.totalorder %s951_s1, %s829_s28  ;;  %s28_s25 = int_to_ptr.vmem [resolvable:$true] %s27_s25 }
  0x17   :  { %p833_p9 = scmp.lt.u32.totalorder %s829_s28, %s951_s1 }
  0x19   :  { %p835_p10 = pnand %p833_p9, %p830_p8 }
  0x1b   :  { %838 = shalt.err (!%p835_p10)
}
  0x1c   :  { %s839_s5 = scalar_lea.vmem %s28_s25, 512  ;;  %p844_p12 = scmp.lt.s32.totalorder %s28_s25, %s28_s25 }
  0x1d   :  { %p840_p11 = scmp.ne.s32.totalorder %s28_s25, %s839_s5  ;;  %p845_p13 = scmp.lt.s32.totalorder %s839_s5, %s839_s5 }
  0x1f   :  { %p846_p0 = por %p845_p13, %p844_p12 }
  0x21   :  { %p847_p1 = pnand %p846_p0, %p840_p11 }
  0x23   :  { %850 = shalt.err (!%p847_p1)
}
  0x24   :  { %33 = dma.hbm_to_vmem [thread:$0]  %s951_s1, 512, %s28_s25, [#allocation6], %s880_s20, %s880_s20, %s881_s21  }
  0x25   :  { %873 = dma.done.wait [#allocation3], 256  }
  0x26   :  { %874 = vsyncadd [#allocation3], 4294967040 }
  0x27   :  { %875 = dma.done.wait [#allocation6], 512  }
  0x28   :  { %876 = vsyncadd [#allocation6], 4294966784  ;;  %vm46_vm0 = vcmask 261120   ;;  %v42_v0 = vld [vmem:[#allocation5] sm:$0xff]  ;;  %v43_v1 = vld [vmem:[#allocation5 + $0x8] sm:$0xff]  ;;  %s883_s1 = smov 127  }
  0x29   :  { %v44_v2 = vld [vmem:[#allocation5 + $0x10] sm:$0xff]  ;;  %v54_v3 = vand.u32 4294901760, %v42_v0  ;;  %v57_v4 = vand.u32 4294901760, %v43_v1  ;;  %v45_v5 = vld [vmem:[#allocation5 + $0x18] sm:$0xff]  ;;  %s884_s7 = smov 126   ;;  %v885_v53 = vmov 0.0  }
  0x2a   :  { %v60_v6 = vand.u32 4294901760, %v44_v2  ;;  %v40_v7 = vld [vmem:[#allocation2] sm:$0xff]  ;;  %v41_v8 = vld [vmem:[#allocation2 + $0x8] sm:$0xff]  ;;  %v63_v9 = vand.u32 4294901760, %v45_v5  ;;  %s886_s8 = smov [#allocation7]  }
  0x2b   :  { %v48_v10 = vsel %vm46_vm0, %v40_v7, 0  ;;  %v51_v11 = vsel %vm46_vm0, %v41_v8, 0  ;;  %v742_v12 = vpack.c.bf16 %v57_v4, %v54_v3  ;;  %v144_v15 = vsub.f32 %v42_v0, %v54_v3  ;;  %s628_s9 = sshll.u32 %s886_s8, 4  ;;  %s629_s9 = int_to_ptr.vmem [resolvable:$true] %s628_s9 }
  0x2c   :  { %v926_v13 = vand.u32 4294901760, %v48_v10  ;;  %v928_v14 = vand.u32 4294901760, %v51_v11  ;;  %v746_v16 = vpack.c.bf16 %v63_v9, %v60_v6  ;;  %v151_v17 = vsub.f32 %v43_v1, %v57_v4  ;;  %s851_s10 = scalar_lea.vmem %s629_s9, 16  ;;  %s855_s11 = scalar_lea.vmem %s629_s9, 32 }
  0x2d   :  { %v158_v18 = vsub.f32 %v44_v2, %v60_v6  ;;  %v165_v19 = vsub.f32 %v45_v5, %v63_v9  ;;  %743 = vmatprep.subr.bf16.mxu1 %v742_v12  ;;  %767 = vmatprep.subr.bf16.mxu0 %v742_v12  ;;  %v145_v22 = vand.u32 4294901760, %v144_v15  ;;  %p852_p2 = scmp.ne.s32.totalorder %s629_s9, %s851_s10  ;;  %p856_p3 = scmp.lt.s32.totalorder %s629_s9, %s629_s9 }
  0x2e   :  { %v123_v20 = vsub.f32 %v48_v10, %v926_v13  ;;  %v133_v21 = vsub.f32 %v51_v11, %v928_v14  ;;  %745 = vmatpush3.bf16.msra.mxu1 %v742_v12  ;;  %769 = vmatpush3.bf16.msra.mxu0 %v742_v12  ;;  %v152_v23 = vand.u32 4294901760, %v151_v17  ;;  %v758_v44 = vpack.c.bf16 %v151_v17, %v144_v15  ;;  %p857_p4 = scmp.lt.s32.totalorder %s855_s11, %s851_s10 }
  0x2f   :  { %v159_v24 = vand.u32 4294901760, %v158_v18  ;;  %v166_v25 = vand.u32 4294901760, %v165_v19  ;;  %747 = vmatprep.subr.bf16.mxu1 %v746_v16  ;;  %771 = vmatprep.subr.bf16.mxu0 %v746_v16  ;;  %v146_v28 = vsub.f32 %v144_v15, %v145_v22  ;;  %v762_v45 = vpack.c.bf16 %v165_v19, %v158_v18 }
  0x30   :  { %v124_v26 = vand.u32 4294901760, %v123_v20  ;;  %v134_v27 = vand.u32 4294901760, %v133_v21  ;;  %v153_v29 = vsub.f32 %v151_v17, %v152_v23  ;;  %v774_v30 = vpack.c.bf16 %v152_v23, %v145_v22  ;;  %p858_p5 = por %p857_p4, %p856_p3 }
  0x31   :  { %v160_v31 = vsub.f32 %v158_v18, %v159_v24  ;;  %v167_v32 = vsub.f32 %v165_v19, %v166_v25  ;;  %v147_v35 = vand.u32 4294901760, %v146_v28  ;;  %v778_v43 = vpack.c.bf16 %v166_v25, %v159_v24 }
  0x32   :  { %v125_v33 = vsub.f32 %v123_v20, %v124_v26  ;;  %717 = vmatprep.mubr.f32.mxu0 %v124_v26  ;;  %v135_v34 = vsub.f32 %v133_v21, %v134_v27  ;;  %749 = vmatpush3.bf16.msra.mxu1 %v746_v16  ;;  %v154_v36 = vand.u32 4294901760, %v153_v29  ;;  %p859_p6 = pnand %p858_p5, %p852_p2 }
  0x33   :  { %773 = vmatpush3.bf16.msra.mxu0 %v746_v16  ;;  %v161_v37 = vand.u32 4294901760, %v160_v31  ;;  %v168_v38 = vand.u32 4294901760, %v167_v32 }
  0x34   :  { %v126_v39 = vand.u32 4294901760, %v125_v33  ;;  %v136_v40 = vand.u32 4294901760, %v135_v34  ;;  %775 = vmatprep.subr.bf16.mxu0 %v774_v30  ;;  %v750_v41 = vpack.c.bf16 %v154_v36, %v147_v35 }
  0x35   :  { %v754_v42 = vpack.c.bf16 %v168_v38, %v161_v37 }
  0x36   :  { %684 = vmatprep.mubr.f32.mxu1 %v126_v39  ;;  %718 = vmatmul.mubr.f32.vlgmr.msra.gmra.mrb[0].mxu0 %v134_v27 }
  0x37   :  { %685 = vmatmul.mubr.f32.vlgmr.msra.gmra.mrb[0].mxu1 %v136_v40  ;;  %751 = vmatprep.subr.bf16.mxu1 %v750_v41 }
  0x38   :  { %753 = vmatpush3.bf16.msra.mxu1 %v750_v41  ;;  %777 = vmatpush3.bf16.msra.mxu0 %v774_v30 }
  0x39   :  { %755 = vmatprep.subr.bf16.mxu1 %v754_v42  ;;  %779 = vmatprep.subr.bf16.mxu0 %v778_v43 }
  0x3a   :  { %695 = vmatprep.mubr.f32.mxu1 %v926_v13  ;;  %728 = vmatprep.mubr.f32.mxu0 %v926_v13 }
  0x3c   :  { %757 = vmatpush3.bf16.msra.mxu1 %v754_v42  ;;  %781 = vmatpush3.bf16.msra.mxu0 %v778_v43 }
  0x3d   :  { %759 = vmatprep.subr.bf16.mxu1 %v758_v44  ;;  %783 = vmatprep.subr.bf16.mxu0 %v742_v12 }
  0x3f   :  { %696 = vmatmul.mubr.f32.vlgmr.msra.gmra.mrb[0].mxu1 %v928_v14  ;;  %729 = vmatmul.mubr.f32.vlgmr.msra.gmra.mrb[0].mxu0 %v928_v14 }
  0x40   :  { %761 = vmatpush3.bf16.msra.mxu1 %v758_v44  ;;  %785 = vmatpush3.bf16.msra.mxu0 %v742_v12 }
  0x41   :  { %763 = vmatprep.subr.bf16.mxu1 %v762_v45  ;;  %787 = vmatprep.subr.bf16.mxu0 %v746_v16 }
  0x42   :  { %706 = vmatprep.mubr.f32.mxu1 %v123_v20  ;;  %739 = vmatprep.mubr.f32.mxu0 %v926_v13 }
  0x44   :  { %765 = vmatpush3.bf16.msra.mxu1 %v762_v45  ;;  %789 = vmatpush3.bf16.msra.mxu0 %v746_v16 }
  0x47   :  { %707 = vmatmul.mubr.f32.vlgmr.msra.gmra.mrb[0].mxu1 %v133_v21  ;;  %740 = vmatmul.mubr.f32.vlgmr.msra.gmra.mrb[0].mxu0 %v928_v14 }
 0x11a   :  { %v708_v46 = vpop.f32.mrb[0].mxu1  ;;  %v741_v47 = vpop.f32.mrb[0].mxu0 }
 0x11b   :  { %v315_v48 = vpop.f32.mrb[1].mxu1  ;;  %v571_v49 = vpop.f32.mrb[1].mxu0 }
 0x11c   :  { %v790_v50 = vadd.f32 %v571_v49, %v315_v48 }
 0x11e   :  { %582 = vrot.lane.b32.xlu0 %v790_v50, %s883_s1 }
 0x122   :  { %586 = vrot.lane.b32.xlu0 %v790_v50, %s884_s7 }
 0x190   :  { %v583_v51 = vpop.permute.xlu0 %582 }
 0x191   :  { %vm590_vm1 = vcmp.lt.f32.partialorder %v583_v51, %v790_v50 }
 0x194   :  { %v587_v52 = vpop.permute.xlu0 %586 }
 0x195   :  { %vm592_vm2 = vcmp.gt.f32.partialorder %v587_v52, %v583_v51 }
 0x196   :  { %vm594_vm3 = vmand %vm590_vm1, %vm592_vm2 }
 0x197   :  { %v638_v54 = vsel %vm594_vm3, 1.0, %v885_v53 }
 0x198   :  { %v615_v55 = vrot.slane %v638_v54, 4 }
 0x19a   :  { %v616_v56 = vadd.f32 %v638_v54, %v615_v55 }
 0x19c   :  { %v617_v57 = vrot.slane %v616_v56, 2 }
 0x19e   :  { %v618_v58 = vadd.f32 %v617_v57, %v616_v56 }
 0x1a0   :  { %v619_v59 = vrot.slane %v618_v58, 1 }
 0x1a2   :  { %v620_v60 = vadd.f32 %v619_v59, %v618_v58 }
 0x1a4   :  { %621 = vst [vmem:[#allocation7] sm:$0x1] %v620_v60 }
 0x1a5   :  { %862 = shalt.err (!%p859_p6)
}
 0x1a6   :  { %s863_s14 = scalar_lea.hbm %s952_s2, 16 }
 0x1a7   :  { %p864_p7 = scmp.ne.s32.totalorder %s952_s2, %s863_s14  ;;  %p867_p8 = scmp.lt.u32.totalorder %s863_s14, %s952_s2 }
 0x1a9   :  { %p869_p9 = pnand %p867_p8, %p864_p7 }
 0x1ab   :  { %872 = shalt.err (!%p869_p9)
}
 0x1ac   :  { %631 = dma.vmem_to_hbm [thread:$0]  %s629_s9, 16, %s952_s2, [#allocation4]  }
 0x1ad   :  { %877 = dma.done.wait [#allocation4], 16  }
 0x1ae   :  { %878 = vsyncadd [#allocation4], 4294967280 }
 0x1af   :  { %635 = vsyncpa [#allocation3], 1 }
 0x1b0   :  { %636 = vsyncpa [#allocation6], 1 }
 0x1b1   :  { %637 = vsyncpa [#allocation4], 1 }

</bundles_post_ra>
